<compile_context>
chip_gen: v6e
topology: v6e:2x2x1
jax: 0.10.0
libtpu: 0.0.40
codegen_flags: <defaults>
</compile_context>

<pallas_src>
import jax
import jax.numpy as jnp
from jax.experimental import pallas as pl
from jax.experimental.pallas import tpu as pltpu

LANE = 128
_BN_EPS = 1e-5


def _round_up(n, m):
    return ((n + m - 1) // m) * m


def mlp_kernel(x_ref, w1_ref, b1_ref, wh_ref, bh_ref, g_ref, bt_ref,
               w2_ref, b2_ref, out_ref, h_ref):
    layer = pl.program_id(0)

    # Layer 0: first linear into the resident activation scratch.
    @pl.when(layer == 0)
    def _():
        h_ref[...] = (
            jnp.dot(x_ref[...].astype(jnp.bfloat16), w1_ref[...],
                    preferred_element_type=jnp.float32) + b1_ref[...])

    # Hidden layer `layer`: Linear -> ReLU -> BatchNorm1d (batch statistics).
    h = jnp.dot(h_ref[...].astype(jnp.bfloat16), wh_ref[0],
                preferred_element_type=jnp.float32) + bh_ref[0]
    h = jnp.maximum(h, 0.0)

    # Fused single-pass BN stats in f32: E[x], E[x^2] -> biased variance,
    # one rsqrt, gamma folded into the scale.
    mean = jnp.mean(h, axis=0, keepdims=True)
    mean_sq = jnp.mean(h * h, axis=0, keepdims=True)
    var = jnp.maximum(mean_sq - mean * mean, 0.0)
    scale = g_ref[0] * jax.lax.rsqrt(var + _BN_EPS)
    h = (h - mean) * scale + bt_ref[0]
    h_ref[...] = h

    # Last layer: head matmul, one lane-dense store of the padded output slab.
    @pl.when(layer == pl.num_programs(0) - 1)
    def _():
        a = jnp.maximum(h, 0.0)
        out_ref[...] = (
            jnp.dot(a.astype(jnp.bfloat16), w2_ref[...],
                    preferred_element_type=jnp.float32) + b2_ref[...])


def init_params(key, input_sz, output_sz, d_model, n_layers):
    """Logical-shape params matching the PyTorch module's init.
    Linear weights are stored pre-transposed to (in, out)."""
    k1, k2, k3 = jax.random.split(key, 3)
    bw1 = 1.0 / (input_sz ** 0.5)
    bwh = 1.0 / (d_model ** 0.5)
    return dict(
        # linear_first: default weight init, bias.data.fill_(0)
        w1=jax.random.uniform(k1, (input_sz, d_model), jnp.float32, -bw1, bw1),
        b1=jnp.zeros((d_model,), jnp.float32),
        # hidden Linear layers (PyTorch-default uniform init), stacked
        wh=jax.random.uniform(k2, (n_layers, d_model, d_model), jnp.float32,
                              -bwh, bwh),
        bh=jax.random.uniform(k3, (n_layers, d_model), jnp.float32, -bwh, bwh),
        # BatchNorm1d affine params (gamma=1, beta=0)
        gamma=jnp.ones((n_layers, d_model), jnp.float32),
        beta=jnp.zeros((n_layers, d_model), jnp.float32),
        # linear_second: weight.data.fill_(0), bias.data.fill_(0)
        w2=jnp.zeros((d_model, output_sz), jnp.float32),
        b2=jnp.zeros((output_sz,), jnp.float32),
    )


def prepare_params(p):
    """Pad feature dims to lane multiples (exactly neutral) and cast weights
    to bf16; biases / BN params stay f32."""
    input_sz, d_model = p["w1"].shape
    n_layers = p["wh"].shape[0]
    output_sz = p["w2"].shape[1]
    di = _round_up(input_sz, LANE)
    dm = _round_up(d_model, LANE)
    do = _round_up(output_sz, LANE)

    def pad2(a, r, c):
        return jnp.pad(a, ((0, r - a.shape[0]), (0, c - a.shape[1])))

    kp = dict(
        w1=pad2(p["w1"], di, dm).astype(jnp.bfloat16),
        b1=jnp.pad(p["b1"], (0, dm - d_model)).reshape(1, dm),
        wh=jnp.pad(p["wh"], ((0, 0), (0, dm - d_model), (0, dm - d_model))
                   ).astype(jnp.bfloat16),
        bh=jnp.pad(p["bh"], ((0, 0), (0, dm - d_model))).reshape(n_layers, 1, dm),
        gamma=jnp.pad(p["gamma"], ((0, 0), (0, dm - d_model))
                      ).reshape(n_layers, 1, dm),
        beta=jnp.pad(p["beta"], ((0, 0), (0, dm - d_model))
                     ).reshape(n_layers, 1, dm),
        w2=pad2(p["w2"], dm, do).astype(jnp.bfloat16),
        b2=jnp.pad(p["b2"], (0, do - output_sz)).reshape(1, do),
    )
    meta = dict(input_sz=input_sz, d_model=d_model, output_sz=output_sz,
                n_layers=n_layers, di=di, dm=dm, do=do)
    return kp, meta


def mlp_forward(x, kp, meta):
    """x: (B, input_sz) f32; kp/meta from prepare_params."""
    B = x.shape[0]
    di, dm, do = meta["di"], meta["dm"], meta["do"]
    n_layers = meta["n_layers"]
    assert n_layers >= 1

    xp = jnp.pad(x.astype(jnp.float32), ((0, 0), (0, di - meta["input_sz"])))

    def full(shape):
        return pl.BlockSpec(shape, lambda l, _n=len(shape): (0,) * _n)

    def per_layer(shape):
        return pl.BlockSpec(shape, lambda l: (l, 0, 0))

    in_specs = [
        full((B, di)),           # x          (resident)
        full((di, dm)),          # w1         (resident, used at layer 0)
        full((1, dm)),           # b1
        per_layer((1, dm, dm)),  # wh         (streamed, double-buffered)
        per_layer((1, 1, dm)),   # bh
        per_layer((1, 1, dm)),   # gamma
        per_layer((1, 1, dm)),   # beta
        full((dm, do)),          # w2         (resident, used at last layer)
        full((1, do)),           # b2
    ]
    out_spec = pl.BlockSpec((B, do), lambda l: (0, 0))

    # Advisory cost + explicit VMEM budget (re-derived so it also fits the
    # v7x 64 MiB VMEM / 32 MiB default scoped limit).
    flops = 2 * B * (di * dm + n_layers * dm * dm + dm * do)
    bytes_accessed = (xp.size * 4 + kp["w1"].size * 2 + kp["wh"].size * 2
                      + kp["w2"].size * 2
                      + 4 * (kp["b1"].size + kp["bh"].size + kp["gamma"].size
                             + kp["beta"].size + kp["b2"].size)
                      + B * do * 4)
    resident_bytes = (B * di * 4 + di * dm * 2 + dm * 4 + dm * do * 2
                      + do * 4 + B * do * 4 + B * dm * 4)
    per_layer_bytes = dm * dm * 2 + 3 * dm * 4
    vmem_budget = int(min(64 << 20,
                          max(16 << 20,
                              2 * (resident_bytes + 2 * per_layer_bytes))))

    out_padded = pl.pallas_call(
        mlp_kernel,
        out_shape=jax.ShapeDtypeStruct((B, do), jnp.float32),
        grid=(n_layers,),
        in_specs=in_specs,
        out_specs=out_spec,
        scratch_shapes=[pltpu.VMEM((B, dm), jnp.float32)],
        compiler_params=pltpu.CompilerParams(
            dimension_semantics=("arbitrary",),
            vmem_limit_bytes=vmem_budget),
        cost_estimate=pl.CostEstimate(
            flops=flops, transcendentals=n_layers * dm,
            bytes_accessed=bytes_accessed),
    )(xp, kp["w1"], kp["b1"], kp["wh"], kp["bh"], kp["gamma"], kp["beta"],
      kp["w2"], kp["b2"])

    # slice off lane padding, then `out.squeeze()` like the PyTorch module
    return jnp.squeeze(out_padded[:, :meta["output_sz"]])


def reference_forward(x, p):
    """Pure-JAX reference on the logical (unpadded) params, mirroring the
    kernel's bf16-input / f32-accumulate matmul policy."""
    def bdot(a, w):
        return jnp.dot(a.astype(jnp.bfloat16), w.astype(jnp.bfloat16),
                       preferred_element_type=jnp.float32)

    h = bdot(x, p["w1"]) + p["b1"]
    for i in range(p["wh"].shape[0]):
        h = bdot(h, p["wh"][i]) + p["bh"][i]
        h = jnp.maximum(h, 0.0)
        mean = jnp.mean(h, axis=0, keepdims=True)
        mean_sq = jnp.mean(h * h, axis=0, keepdims=True)
        var = jnp.maximum(mean_sq - mean * mean, 0.0)
        h = (h - mean) * (p["gamma"][i] * jax.lax.rsqrt(var + _BN_EPS)) \
            + p["beta"][i]
    a = jnp.maximum(h, 0.0)
    return jnp.squeeze(bdot(a, p["w2"]) + p["b2"])


if __name__ == "__main__":
    batch, input_sz, output_sz = 8, 16, 8
    d_model, n_layers = 32, 2

    key = jax.random.PRNGKey(0)
    kx, kparam, khead = jax.random.split(key, 3)
    x = jax.random.normal(kx, (batch, input_sz), jnp.float32)

    # 1) faithful PyTorch init (linear_second weight & bias zero-filled)
    params = init_params(kparam, input_sz, output_sz, d_model, n_layers)
    kparams, meta = prepare_params(params)
    out = jax.block_until_ready(mlp_forward(x, kparams, meta))
    assert out.shape == (batch, output_sz)
    ref = reference_forward(x, params)
    assert jnp.allclose(out, ref, atol=1e-2, rtol=1e-2)

    # 2) exercise head-matmul numerics with a non-zero linear_second weight
    params_nz = dict(params)
    bw2 = 1.0 / (d_model ** 0.5)
    params_nz["w2"] = jax.random.uniform(khead, (d_model, output_sz),
                                         jnp.float32, -bw2, bw2)
    kparams_nz, meta_nz = prepare_params(params_nz)
    out_nz = jax.block_until_ready(mlp_forward(x, kparams_nz, meta_nz))
    ref_nz = reference_forward(x, params_nz)
    assert out_nz.shape == (batch, output_sz)
    assert jnp.allclose(out_nz, ref_nz, atol=1e-2, rtol=1e-2)

    print("KERNEL_OK")
</pallas_src>

<mosaic_0001>
module attributes {stable_mosaic.version = 11 : i64} {
  func.func @mlp_kernel(%arg0: i32, %arg1: memref<8x128xf32, #tpu.memory_space<vmem>>, %arg2: memref<128x128xbf16, #tpu.memory_space<vmem>>, %arg3: memref<1x128xf32, #tpu.memory_space<vmem>>, %arg4: memref<1x128x128xbf16, #tpu.memory_space<vmem>>, %arg5: memref<1x1x128xf32, #tpu.memory_space<vmem>>, %arg6: memref<1x1x128xf32, #tpu.memory_space<vmem>>, %arg7: memref<1x1x128xf32, #tpu.memory_space<vmem>>, %arg8: memref<128x128xbf16, #tpu.memory_space<vmem>>, %arg9: memref<1x128xf32, #tpu.memory_space<vmem>>, %arg10: memref<8x128xf32, #tpu.memory_space<vmem>>, %arg11: memref<8x128xf32, #tpu.memory_space<vmem>>) attributes {dimension_semantics = [#tpu.dimension_semantics<arbitrary>], iteration_bounds = array<i64: 2>, scalar_prefetch = 0 : i64, scratch_operands = 1 : i64, tpu.core_type = #tpu.core_type<tc>, window_params = [{pipeline_mode = #tpu.pipeline_mode<synchronous>, transform_indices = @transform_0, window_bounds = array<i64: 8, 128>}, {pipeline_mode = #tpu.pipeline_mode<synchronous>, transform_indices = @transform_1, window_bounds = array<i64: 128, 128>}, {pipeline_mode = #tpu.pipeline_mode<synchronous>, transform_indices = @transform_2, window_bounds = array<i64: 1, 128>}, {transform_indices = @transform_3, window_bounds = array<i64: 1, 128, 128>}, {transform_indices = @transform_4, window_bounds = array<i64: 1, 1, 128>}, {transform_indices = @transform_5, window_bounds = array<i64: 1, 1, 128>}, {transform_indices = @transform_6, window_bounds = array<i64: 1, 1, 128>}, {pipeline_mode = #tpu.pipeline_mode<synchronous>, transform_indices = @transform_7, window_bounds = array<i64: 128, 128>}, {pipeline_mode = #tpu.pipeline_mode<synchronous>, transform_indices = @transform_8, window_bounds = array<i64: 1, 128>}, {pipeline_mode = #tpu.pipeline_mode<synchronous>, transform_indices = @transform_9, window_bounds = array<i64: 8, 128>}]} {
    %c0_i32 = arith.constant 0 : i32
    %0 = arith.cmpi eq, %arg0, %c0_i32 : i32
    %1 = arith.extui %0 : i1 to i32
    %c0_i32_0 = arith.constant 0 : i32
    %2 = arith.cmpi ne, %1, %c0_i32_0 : i32
    scf.if %2 {
      %c0_24 = arith.constant 0 : index
      %c0_25 = arith.constant 0 : index
      %45 = vector.load %arg1[%c0_24, %c0_25] : memref<8x128xf32, #tpu.memory_space<vmem>>, vector<8x128xf32>
      %46 = arith.truncf %45 : vector<8x128xf32> to vector<8x128xbf16>
      %c0_26 = arith.constant 0 : index
      %c0_27 = arith.constant 0 : index
      %47 = vector.load %arg2[%c0_26, %c0_27] : memref<128x128xbf16, #tpu.memory_space<vmem>>, vector<128x128xbf16>
      %cst_28 = arith.constant dense<0.000000e+00> : vector<8x128xf32>
      %48 = tpu.matmul %46, %47, %cst_28 {dimension_numbers = #tpu.dot_dimension_numbers<[1], [0], [0], [1], [0, 0, 1, 1], [], []>} : vector<8x128xbf16>, vector<128x128xbf16>, vector<8x128xf32> -> vector<8x128xf32>
      %c0_29 = arith.constant 0 : index
      %c0_30 = arith.constant 0 : index
      %49 = vector.load %arg3[%c0_29, %c0_30] : memref<1x128xf32, #tpu.memory_space<vmem>>, vector<1x128xf32>
      %50 = vector.broadcast %49 : vector<1x128xf32> to vector<8x128xf32>
      %51 = arith.addf %48, %50 : vector<8x128xf32>
      %c0_31 = arith.constant 0 : index
      %c0_32 = arith.constant 0 : index
      %52 = vector.load %arg11[%c0_31, %c0_32] : memref<8x128xf32, #tpu.memory_space<vmem>>, vector<8x128xf32>
      tpu.vector_store %arg11[%c0_31, %c0_32], %51 {strides = array<i32>} : memref<8x128xf32, #tpu.memory_space<vmem>>, vector<8x128xf32>,
    } else {
    }
    %c0 = arith.constant 0 : index
    %c0_1 = arith.constant 0 : index
    %3 = vector.load %arg11[%c0, %c0_1] : memref<8x128xf32, #tpu.memory_space<vmem>>, vector<8x128xf32>
    %4 = arith.truncf %3 : vector<8x128xf32> to vector<8x128xbf16>
    %c0_2 = arith.constant 0 : index
    %c0_3 = arith.constant 0 : index
    %c0_4 = arith.constant 0 : index
    %5 = vector.load %arg4[%c0_2, %c0_3, %c0_4] : memref<1x128x128xbf16, #tpu.memory_space<vmem>>, vector<1x128x128xbf16>
    %6 = vector.shape_cast %5 : vector<1x128x128xbf16> to vector<128x128xbf16>
    %cst = arith.constant dense<0.000000e+00> : vector<8x128xf32>
    %7 = tpu.matmul %4, %6, %cst {dimension_numbers = #tpu.dot_dimension_numbers<[1], [0], [0], [1], [0, 0, 1, 1], [], []>} : vector<8x128xbf16>, vector<128x128xbf16>, vector<8x128xf32> -> vector<8x128xf32>
    %c0_5 = arith.constant 0 : index
    %c0_6 = arith.constant 0 : index
    %c0_7 = arith.constant 0 : index
    %8 = vector.load %arg5[%c0_5, %c0_6, %c0_7] : memref<1x1x128xf32, #tpu.memory_space<vmem>>, vector<1x1x128xf32>
    %9 = vector.shape_cast %8 : vector<1x1x128xf32> to vector<1x128xf32>
    %10 = vector.broadcast %9 : vector<1x128xf32> to vector<8x128xf32>
    %11 = arith.addf %7, %10 : vector<8x128xf32>
    %cst_8 = arith.constant 0.000000e+00 : f32
    %12 = vector.broadcast %cst_8 : f32 to vector<8x128xf32>
    %13 = arith.maximumf %11, %12 : vector<8x128xf32>
    %cst_9 = arith.constant dense<0.000000e+00> : vector<128xf32>
    %14 = vector.multi_reduction <add>, %13, %cst_9 [0] : vector<8x128xf32> to vector<128xf32>
    %15 = vector.shape_cast %14 : vector<128xf32> to vector<1x128xf32>
    %cst_10 = arith.constant 8.000000e+00 : f32
    %16 = vector.broadcast %cst_10 : f32 to vector<1x128xf32>
    %17 = arith.divf %15, %16 : vector<1x128xf32>
    %18 = arith.mulf %13, %13 : vector<8x128xf32>
    %cst_11 = arith.constant dense<0.000000e+00> : vector<128xf32>
    %19 = vector.multi_reduction <add>, %18, %cst_11 [0] : vector<8x128xf32> to vector<128xf32>
    %20 = vector.shape_cast %19 : vector<128xf32> to vector<1x128xf32>
    %cst_12 = arith.constant 8.000000e+00 : f32
    %21 = vector.broadcast %cst_12 : f32 to vector<1x128xf32>
    %22 = arith.divf %20, %21 : vector<1x128xf32>
    %23 = arith.mulf %17, %17 : vector<1x128xf32>
    %24 = arith.subf %22, %23 : vector<1x128xf32>
    %cst_13 = arith.constant 0.000000e+00 : f32
    %25 = vector.broadcast %cst_13 : f32 to vector<1x128xf32>
    %26 = arith.maximumf %24, %25 : vector<1x128xf32>
    %c0_14 = arith.constant 0 : index
    %c0_15 = arith.constant 0 : index
    %c0_16 = arith.constant 0 : index
    %27 = vector.load %arg6[%c0_14, %c0_15, %c0_16] : memref<1x1x128xf32, #tpu.memory_space<vmem>>, vector<1x1x128xf32>
    %28 = vector.shape_cast %27 : vector<1x1x128xf32> to vector<1x128xf32>
    %cst_17 = arith.constant 9.99999974E-6 : f32
    %29 = vector.broadcast %cst_17 : f32 to vector<1x128xf32>
    %30 = arith.addf %26, %29 : vector<1x128xf32>
    %31 = math.rsqrt %30 : vector<1x128xf32>
    %32 = arith.mulf %28, %31 : vector<1x128xf32>
    %33 = vector.broadcast %17 : vector<1x128xf32> to vector<8x128xf32>
    %34 = arith.subf %13, %33 : vector<8x128xf32>
    %35 = vector.broadcast %32 : vector<1x128xf32> to vector<8x128xf32>
    %36 = arith.mulf %34, %35 : vector<8x128xf32>
    %c0_18 = arith.constant 0 : index
    %c0_19 = arith.constant 0 : index
    %c0_20 = arith.constant 0 : index
    %37 = vector.load %arg7[%c0_18, %c0_19, %c0_20] : memref<1x1x128xf32, #tpu.memory_space<vmem>>, vector<1x1x128xf32>
    %38 = vector.shape_cast %37 : vector<1x1x128xf32> to vector<1x128xf32>
    %39 = vector.broadcast %38 : vector<1x128xf32> to vector<8x128xf32>
    %40 = arith.addf %36, %39 : vector<8x128xf32>
    %c0_21 = arith.constant 0 : index
    %c0_22 = arith.constant 0 : index
    %41 = vector.load %arg11[%c0_21, %c0_22] : memref<8x128xf32, #tpu.memory_space<vmem>>, vector<8x128xf32>
    tpu.vector_store %arg11[%c0_21, %c0_22], %40 {strides = array<i32>} : memref<8x128xf32, #tpu.memory_space<vmem>>, vector<8x128xf32>,
    %c1_i32 = arith.constant 1 : i32
    %42 = arith.cmpi eq, %arg0, %c1_i32 : i32
    %43 = arith.extui %42 : i1 to i32
    %c0_i32_23 = arith.constant 0 : i32
    %44 = arith.cmpi ne, %43, %c0_i32_23 : i32
    scf.if %44 {
      %cst_24 = arith.constant 0.000000e+00 : f32
      %45 = vector.broadcast %cst_24 : f32 to vector<8x128xf32>
      %46 = arith.maximumf %40, %45 : vector<8x128xf32>
      %47 = arith.truncf %46 : vector<8x128xf32> to vector<8x128xbf16>
      %c0_25 = arith.constant 0 : index
      %c0_26 = arith.constant 0 : index
      %48 = vector.load %arg8[%c0_25, %c0_26] : memref<128x128xbf16, #tpu.memory_space<vmem>>, vector<128x128xbf16>
      %cst_27 = arith.constant dense<0.000000e+00> : vector<8x128xf32>
      %49 = tpu.matmul %47, %48, %cst_27 {dimension_numbers = #tpu.dot_dimension_numbers<[1], [0], [0], [1], [0, 0, 1, 1], [], []>} : vector<8x128xbf16>, vector<128x128xbf16>, vector<8x128xf32> -> vector<8x128xf32>
      %c0_28 = arith.constant 0 : index
      %c0_29 = arith.constant 0 : index
      %50 = vector.load %arg9[%c0_28, %c0_29] : memref<1x128xf32, #tpu.memory_space<vmem>>, vector<1x128xf32>
      %51 = vector.broadcast %50 : vector<1x128xf32> to vector<8x128xf32>
      %52 = arith.addf %49, %51 : vector<8x128xf32>
      %c0_30 = arith.constant 0 : index
      %c0_31 = arith.constant 0 : index
      %53 = vector.load %arg10[%c0_30, %c0_31] : memref<8x128xf32, #tpu.memory_space<vmem>>, vector<8x128xf32>
      tpu.vector_store %arg10[%c0_30, %c0_31], %52 {strides = array<i32>} : memref<8x128xf32, #tpu.memory_space<vmem>>, vector<8x128xf32>,
    } else {
    }
    return
  }
  func.func @transform_0(%arg0: i32) -> (i32, i32) {
    %c0_i32 = arith.constant 0 : i32
    %c0_i32_0 = arith.constant 0 : i32
    %c0_i32_1 = arith.constant 0 : i32
    return %c0_i32, %c0_i32_0 : i32, i32
  }
  func.func @transform_1(%arg0: i32) -> (i32, i32) {
    %c0_i32 = arith.constant 0 : i32
    %c0_i32_0 = arith.constant 0 : i32
    %c0_i32_1 = arith.constant 0 : i32
    return %c0_i32, %c0_i32_0 : i32, i32
  }
  func.func @transform_2(%arg0: i32) -> (i32, i32) {
    %c0_i32 = arith.constant 0 : i32
    %c0_i32_0 = arith.constant 0 : i32
    %c0_i32_1 = arith.constant 0 : i32
    return %c0_i32, %c0_i32_0 : i32, i32
  }
  func.func @transform_3(%arg0: i32) -> (i32, i32, i32) {
    %c0_i32 = arith.constant 0 : i32
    %c0_i32_0 = arith.constant 0 : i32
    %c0_i32_1 = arith.constant 0 : i32
    return %arg0, %c0_i32, %c0_i32_0 : i32, i32, i32
  }
  func.func @transform_4(%arg0: i32) -> (i32, i32, i32) {
    %c0_i32 = arith.constant 0 : i32
    %c0_i32_0 = arith.constant 0 : i32
    %c0_i32_1 = arith.constant 0 : i32
    return %arg0, %c0_i32, %c0_i32_0 : i32, i32, i32
  }
  func.func @transform_5(%arg0: i32) -> (i32, i32, i32) {
    %c0_i32 = arith.constant 0 : i32
    %c0_i32_0 = arith.constant 0 : i32
    %c0_i32_1 = arith.constant 0 : i32
    return %arg0, %c0_i32, %c0_i32_0 : i32, i32, i32
  }
  func.func @transform_6(%arg0: i32) -> (i32, i32, i32) {
    %c0_i32 = arith.constant 0 : i32
    %c0_i32_0 = arith.constant 0 : i32
    %c0_i32_1 = arith.constant 0 : i32
    return %arg0, %c0_i32, %c0_i32_0 : i32, i32, i32
  }
  func.func @transform_7(%arg0: i32) -> (i32, i32) {
    %c0_i32 = arith.constant 0 : i32
    %c0_i32_0 = arith.constant 0 : i32
    %c0_i32_1 = arith.constant 0 : i32
    return %c0_i32, %c0_i32_0 : i32, i32
  }
  func.func @transform_8(%arg0: i32) -> (i32, i32) {
    %c0_i32 = arith.constant 0 : i32
    %c0_i32_0 = arith.constant 0 : i32
    %c0_i32_1 = arith.constant 0 : i32
    return %c0_i32, %c0_i32_0 : i32, i32
  }
  func.func @transform_9(%arg0: i32) -> (i32, i32) {
    %c0_i32 = arith.constant 0 : i32
    %c0_i32_0 = arith.constant 0 : i32
    %c0_i32_1 = arith.constant 0 : i32
    return %c0_i32, %c0_i32_0 : i32, i32
  }
}

</mosaic_0001>

<bundles_post_ra>
// kernel: tpu_custom_call.1
= control target key start
LH: loop header
LB: loop body
LE: loop exit
PB: predicated region body
PF: predicated region fallthrough
CT: control target
= control target key end

     0   :  { %s1643_s0 = inlined_call_operand.hbm [shape: f32[8,128], index: 0, kind: input, shape index: {}]   ;;  %s1644_s1 = inlined_call_operand.hbm [shape: bf16[128,128], index: 1, kind: input, shape index: {}]   ;;  %s1645_s2 = inlined_call_operand.vmem [shape: f32[1,128], index: 2, kind: input, shape index: {}]   ;;  %s1646_s3 = inlined_call_operand.hbm [shape: bf16[2,128,128], index: 3, kind: input, shape index: {}]   ;;  %s1647_s4 = inlined_call_operand.vmem [shape: f32[2,1,128], index: 4, kind: input, shape index: {}]   ;;  %s1648_s5 = inlined_call_operand.vmem [shape: f32[2,1,128], index: 5, kind: input, shape index: {}]   ;;  %s1649_s6 = inlined_call_operand.vmem [shape: f32[2,1,128], index: 6, kind: input, shape index: {}]   ;;  %s1650_s7 = inlined_call_operand.hbm [shape: bf16[128,128], index: 7, kind: input, shape index: {}]   ;;  %s1651_s8 = inlined_call_operand.vmem [shape: f32[1,128], index: 8, kind: input, shape index: {}]   ;;  %s1652_s9 = inlined_call_operand.hbm [shape: f32[8,128], index: 9, kind: output, shape index: {}]  }
   0x1   :  { %1657 = sst [smem:[#allocation17_spill]] %s1643_s0 }
   0x2   :  { %1658 = sst [smem:[#allocation18_spill]] %s1644_s1 }
   0x3   :  { %14 = vsyncpa [#allocation4], 0 }
   0x4   :  { %15 = vsyncpa [#allocation7], 0 }
   0x5   :  { %16 = vsyncpa [#allocation5], 0  ;;  %s1415_s30 = smov 0   ;;  %s1417_s10 = smov 0  }
   0x6   :  { %s1419_s11 = smov 0   ;;  %s1421_s12 = smov 0  }
   0x7 LB: > { %s1434_s13 = sadd.s32 4294967295, %s1350_s12   ;;  %s1437_s14 = sadd.s32 1, %s1350_s12   ;;  %s1350_s12 = sphi %s1421_s12, %s1681_s12   ;;  %s1346_s11 = sphi %s1419_s11, %s1680_s11   ;;  %s1342_s10 = sphi %s1417_s10, %s1679_s10   ;;  %s1338_s30 = sphi %s1415_s30, %s1678_s30  }
   0x8   : > { %s89_s15 = ssub.s32 %s1350_s12, %s1437_s14  ;;  %s92_s16 = sadd.s32 1, %s1346_s11 }
   0x9   : > { %p90_p0 = scmp.eq.s32.totalorder %s89_s15, 0  ;;  %p99_p1 = scmp.ne.s32.totalorder %s1346_s11, %s1342_s10 }
   0xa   : > { %p100_p2 = scmp.eq.s32.totalorder %s1350_s12, 0  ;;  %p105_p3 = scmp.ne.s32.totalorder %s1342_s10, %s1338_s30 }
   0xb   : > { %s1447_s17 = scalar_select %p90_p0, %s1346_s11, %s92_s16  }
   0xc   : > { %p1449_p4 = por %p100_p2, %p99_p1  ;;  %p1653_p5 = scmp.eq.s32.totalorder %s1434_s13, 0 }
   0xd   : > { %1659 = sst [smem:[#allocation16_spill]] %s1447_s17  ;;  %p924_p6 = scmp.ge.s32.totalorder %s1350_s12, 1 }
   0xe   : > { %p257_p7 = scmp.lt.s32.totalorder %s1350_s12, 3  ;;  %p1458_p8 = por %p1653_p5, %p105_p3 }
   0xf   : > { %s1352_s21 = smov [#allocation3]   ;;  %p1094_p12 = scmp.lt.s32.totalorder %s1350_s12, 2 }
  0x10   : > { %s1661_s19 = scalar_select %p1458_p8, 1, 0 }
  0x11   : > { %p1463_p10 = pnand %p924_p6, %p257_p7  ;;  %s270_s22 = sshll.u32 %s1352_s21, 4  ;;  %s271_s22 = int_to_ptr.vmem [resolvable:$true] %s270_s22 }
  0x12   : > { %s1353_s24 = smov [#allocation6]   ;;  %p1478_p0 = pnand %p1094_p12, %p1449_p4 }
  0x13   : > { %s1662_s20 = scalar_select %p1463_p10, 1, 0 }
  0x14   : > { %p1077_p11 = pneg %p1463_p10  ;;  %s280_s25 = sshll.u32 %s1353_s24, 4  ;;  %s281_s25 = int_to_ptr.vmem [resolvable:$true] %s280_s25 }
  0x15   : > { %s1664_s26 = scalar_select %p1478_p0, 1, 0 }
  0x16   : > { %p1472_p13 = pnand %p1077_p11, %p1653_p5  ;;  %s1181_s27 = scalar_lea.vmem %s271_s22, 128 }
  0x17   : > { %p1182_p2 = scmp.ne.s32.totalorder %s271_s22, %s1181_s27  ;;  %p1189_p7 = scmp.lt.s32.totalorder %s271_s22, %s271_s22 }
  0x18   : > { %p1172_p1 = pneg %p1472_p13  ;;  %p1190_p11 = scmp.lt.s32.totalorder %s1181_s27, %s1181_s27 }
  0x1a   : > { %p1184_p3 = pnand %p1182_p2, %p1172_p1  ;;  %p1191_p9 = por %p1190_p11, %p1189_p7 }
  0x1c   : > { %p1185_p6 = pneg %p1184_p3 }
  0x1e   : > { %p1192_p5 = pnand %p1191_p9, %p1185_p6 }
  0x20   : > { %1195 = shalt.err (!%p1192_p5)
}
  0x21   : > { %s1665_s0 = sld [smem:[#allocation17_spill]]  ;;  %s1207_s30 = scalar_lea.vmem %s281_s25, 1024 }
  0x22   : > { %p1208_p4 = scmp.ne.s32.totalorder %s281_s25, %s1207_s30  ;;  %p1215_p2 = scmp.lt.s32.totalorder %s281_s25, %s281_s25 }
  0x23   : > { %p1216_p3 = scmp.lt.s32.totalorder %s1207_s30, %s1207_s30 }
  0x24   : > { %p1210_p12 = pnand %p1208_p4, %p1172_p1 }
  0x25   : > { %p1217_p10 = por %p1216_p3, %p1215_p2 }
  0x26   : > { %p1211_p8 = pneg %p1210_p12 }
  0x27   : > { %1080 = dma.hbm_to_vmem [thread:$0]  (!%p1472_p13), %s1665_s0, 128, %s271_s22, [#allocation4]  }
  0x28   : > { %p1218_p0 = pnand %p1217_p10, %p1211_p8 }
  0x2a   : > { %1221 = shalt.err (!%p1218_p0)
}
  0x2b   : > { %s1354_s15 = smov 64   ;;  %s1355_s16 = smov 4  }
  0x2c   : > { %s1666_s1 = sld [smem:[#allocation18_spill]]  ;;  %s313_s22 = sand.u32 1, %s1350_s12  }
  0x2d   : > { %s1356_s24 = smov [#allocation9]   ;;  %s315_s28 = sand.u32 1, %s1346_s11  }
  0x2e   : > { %s296_s27 = sshll.u32 %s1356_s24, 4  ;;  %s297_s27 = int_to_ptr.vmem [resolvable:$true] %s296_s27 }
  0x2f   : > { %s1233_s29 = scalar_lea.vmem %s297_s27, 1024  ;;  %p1241_p10 = scmp.lt.s32.totalorder %s297_s27, %s297_s27 }
  0x30   : > { %p1234_p5 = scmp.ne.s32.totalorder %s297_s27, %s1233_s29  ;;  %p1242_p0 = scmp.lt.s32.totalorder %s1233_s29, %s1233_s29 }
  0x32   : > { %1083 = dma.hbm_to_vmem [thread:$0]  (!%p1472_p13), %s1666_s1, 1024, %s281_s25, [#allocation7], %s1354_s15, %s1354_s15, %s1355_s16  }
  0x33   : > { %p1236_p8 = pnand %p1234_p5, %p1172_p1  ;;  %p1243_p6 = por %p1242_p0, %p1241_p10 }
  0x35   : > { %p1237_p9 = pneg %p1236_p8 }
  0x37   : > { %p1244_p7 = pnand %p1243_p6, %p1237_p9 }
  0x39   : > { %1247 = shalt.err (!%p1244_p7)
}
  0x3a   : > { %1086 = dma.hbm_to_vmem [thread:$0]  (!%p1472_p13), %s1650_s7, 1024, %s297_s27, [#allocation7], %s1354_s15, %s1354_s15, %s1355_s16  }
  0x3b   : > { %s929_s18 = sshll.u32 %s315_s28, 6  ;;  %s971_s21 = sshll.u32 %s1350_s12, 10 }
  0x3c   : > { %s1520_s29 = scalar_lea.hbm %s1646_s3, %s971_s21  ;;  %s317_s23 = scalar_lea.vmem [#allocation8], %s929_s18 }
  0x3d   : > { %s324_s1 = sshll.u32 %s317_s23, 4  ;;  %s1524_s17 = scalar_lea.sflag [#allocation4], %s313_s22  ;;  %s1522_s1 = int_to_ptr.vmem [resolvable:$true] %s324_s1 }
  0x3e   : > { %s1248_s25 = scalar_lea.hbm %s1520_s29, 1024  ;;  %p1667_p11 = scmp.ne.s32.totalorder %s1664_s26, 0 }
  0x3f   : > { %p1249_p1 = scmp.ne.s32.totalorder %s1520_s29, %s1248_s25  ;;  %s1253_s0 = scalar_lea.hbm %s1646_s3, 2048 }
  0x40   : > { %p1250_p13 = pneg %p1667_p11  ;;  %p1254_p2 = scmp.lt.s32.totalorder %s1520_s29, %s1646_s3 }
  0x41   : > { %p1255_p3 = scmp.lt.s32.totalorder %s1253_s0, %s1248_s25 }
  0x42   : > { %p1251_p4 = pnand %p1250_p13, %p1249_p1 }
  0x43   : > { %p1256_p5 = por %p1255_p3, %p1254_p2 }
  0x44   : > { %p1252_p12 = pneg %p1251_p4 }
  0x46   : > { %p1257_p8 = pnand %p1256_p5, %p1252_p12 }
  0x48   : > { %1260 = shalt.err (!%p1257_p8)
}
  0x49   : > { %s1261_s22 = scalar_lea.vmem %s1522_s1, 1024  ;;  %s1357_s18 = smov [#allocation8]  }
  0x4a   : > { %p1262_p9 = scmp.ne.s32.totalorder %s1522_s1, %s1261_s22  ;;  %s1266_s21 = sshll.u32 %s1357_s18, 4  ;;  %s1267_s21 = int_to_ptr.vmem [resolvable:$false] %s1266_s21 }
  0x4b   : > { %s1268_s24 = scalar_lea.vmem %s1267_s21, 2048  ;;  %p1269_p6 = scmp.lt.s32.totalorder %s1522_s1, %s1267_s21 }
  0x4c   : > { %p1264_p10 = pnand %p1262_p9, %p1250_p13  ;;  %p1270_p7 = scmp.lt.s32.totalorder %s1268_s24, %s1261_s22 }
  0x4e   : > { %p1265_p0 = pneg %p1264_p10  ;;  %p1271_p1 = por %p1270_p7, %p1269_p6 }
  0x50   : > { %p1272_p4 = pnand %p1271_p1, %p1265_p0 }
  0x52   : > { %1275 = shalt.err (!%p1272_p4)
}
  0x53   : > { %1090 = dma.hbm_to_vmem [thread:$0]  (!%p1667_p11), %s1520_s29, 1024, %s1522_s1, %s1524_s17, %s1354_s15, %s1354_s15, %s1355_s16  }
  0x54   : > { %p1668_p13 = scmp.ne.s32.totalorder %s1662_s20, 0 }
  0x55   : > { %p1669_p12 = scmp.eq.s32.totalorder (!%p1668_p13), %s1434_s13, 0 }
  0x56   : > { %354 = sbr.rel (%p1668_p13) target bundleno = 866 (0x362), region = 56 }
  0x5b   : > { %1317 = dma.done.wait (%p1669_p12), [#allocation4], 128   ;;  %p1670_p2 = pmov %p1669_p12 }
  0x5d   : > { %1319 = vsyncadd (%p1670_p2), [#allocation4], 4294967168  ;;  %p1671_p3 = pmov %p1670_p2 }
  0x5e   : > { %p1672_p5 = pmov %p1670_p2 }
  0x5f   : > { %1321 = dma.done.wait (%p1671_p3), [#allocation7], 1024  }
  0x60   : > { %1323 = vsyncadd (%p1672_p5), [#allocation7], 4294966272  ;;  %s364_s26 = sand.u32 1, %s1434_s13   ;;  %s366_s1 = sand.u32 1, %s1342_s10  }
  0x61   : > { %s935_s17 = sshll.u32 %s366_s1, 6  ;;  %s365_s20 = scalar_lea.sflag [#allocation4], %s364_s26 }
  0x62   : > { %s1560_s15 = scalar_lea.vmem [#allocation8], %s935_s17  ;;  %p1673_p11 = scmp.ne.s32.totalorder %s1661_s19, 0 }
  0x64   : > { %1325 = dma.done.wait (%p1673_p11), %s365_s20, 1024  }
  0x65   : > { %1327 = vsyncadd (%p1673_p11), %s365_s20, 4294966272  ;;  %p1674_p8 = pmov %p1670_p2 }
  0x66   : > { %p1675_p9 = pmov %p1670_p2 }
  0x67   : > { %1329 = dma.done.wait (%p1674_p8), [#allocation7], 1024  }
  0x68   : > { %1331 = vsyncadd (%p1675_p9), [#allocation7], 4294966272  ;;  %p411_p10 = scmp.lt.s32.totalorder %s1434_s13, 1  ;;  %p1676_p0 = scmp.ne.s32.totalorder %s1434_s13, 0 }
  0x6a   : > { %s1572_s16 = scalar_select %p411_p10, %s1434_s13, 1 }
  0x6b   : > { %424 = sbr.rel (%p1676_p0) target bundleno = 344 (0x158), region = 76 }
  0x6c   : > { %s413_s25 = scalar_lea.vmem %s1647_s4, %s1572_s16  ;;  %s416_s27 = scalar_lea.vmem %s1648_s5, %s1572_s16 }
  0x6d   : > { %s419_s30 = scalar_lea.vmem %s1649_s6, %s1572_s16 }
  0x70   : > { %v1144_v0 = vld [vmem:[#allocation6 + $0x38] sm:$0xff]   ;;  %v1358_v1 = vmov 0.0   ;;  %v1145_v2 = vld [vmem:[#allocation6 + $0x30] sm:$0xff]   ;;  %vm1359_vm0 = vmmov 0   ;;  %v1146_v3 = vld [vmem:[#allocation6 + $0x28] sm:$0xff]  }
  0x71   : > { %999 = vmatprep.subr.bf16.mxu0 %v1358_v1  ;;  %1015 = vmatprep.mubr.msk.bf16.mxu0 %vm1359_vm0, %v1358_v1  ;;  %v1147_v4 = vld [vmem:[#allocation6 + $0x20] sm:$0xff]   ;;  %v1148_v5 = vld [vmem:[#allocation6 + $0x18] sm:$0xff]   ;;  %v1149_v6 = vld [vmem:[#allocation6 + $0x10] sm:$0xff]  }
  0x72   : > { %1000 = vmatpush3.bf16.msra.mxu0 %v1144_v0  ;;  %v1150_v7 = vld [vmem:[#allocation6 + $0x8] sm:$0xff]   ;;  %v1151_v8 = vld [vmem:[#allocation6] sm:$0xff]   ;;  %v425_v9 = vld [vmem:[#allocation3] sm:$0xff] }
  0x73   : > { %1001 = vmatprep.subr.bf16.mxu0 %v1358_v1  ;;  %v426_v10 = vpack.c.bf16 %v425_v9, %v425_v9  ;;  %v938_v11 = vld [vmem:[%s1645_s2] ss:$0 sm:$0xff] }
  0x76   : > { %1002 = vmatpush3.bf16.msra.mxu0 %v1145_v2 }
  0x77   : > { %1003 = vmatprep.subr.bf16.mxu0 %v1358_v1 }
  0x7a   : > { %1004 = vmatpush3.bf16.msra.mxu0 %v1146_v3 }
  0x7b   : > { %1005 = vmatprep.subr.bf16.mxu0 %v1358_v1 }
  0x7e   : > { %1006 = vmatpush3.bf16.msra.mxu0 %v1147_v4 }
  0x7f   : > { %1007 = vmatprep.subr.bf16.mxu0 %v1358_v1 }
  0x82   : > { %1008 = vmatpush3.bf16.msra.mxu0 %v1148_v5 }
  0x83   : > { %1009 = vmatprep.subr.bf16.mxu0 %v1358_v1 }
  0x86   : > { %1010 = vmatpush3.bf16.msra.mxu0 %v1149_v6 }
  0x87   : > { %1011 = vmatprep.subr.bf16.mxu0 %v1358_v1 }
  0x8a   : > { %1012 = vmatpush3.bf16.msra.mxu0 %v1150_v7 }
  0x8b   : > { %1013 = vmatprep.subr.bf16.mxu0 %v1358_v1 }
  0x8e   : > { %1014 = vmatpush3.bf16.msra.mxu0 %v1151_v8 }
  0x91   : > { %1016 = vmatmul.mubr.bf16.vlgmr.msra.gmra.mxu0 %v426_v10 }
 0x151   : > { %v532_v12 = vpop.f32.mrf.mxu0 }
 0x152   : > { %v533_v13 = vadd.f32 %v938_v11, %v532_v12 }
 0x153   : > { %v1017_v14 = vpop.f32.mrf.mxu0 }
 0x154   : > { %538 = vst [vmem:[#allocation2] sm:$0xff] %v533_v13 }
 0x155   : > { %v535_v15 = vpop.f32.mrf.mxu0 }
 0x157   : > { %v1018_v16 = vpop.f32.mrf.mxu0 }
 0x158 PF: > { %v1152_v17 = vld [vmem:[%s1560_s15 + $0x38] sm:$0xff]   ;;  %v1360_v18 = vmov 0.0   ;;  %v1153_v19 = vld [vmem:[%s1560_s15 + $0x30] sm:$0xff]   ;;  %vm1361_vm1 = vmmov 0   ;;  %v1154_v20 = vld [vmem:[%s1560_s15 + $0x28] sm:$0xff]   ;;  %v678_v54 = vlaneseq  ;;  %p957_p6 = scmp.ne.s32.totalorder %s1434_s13, 1 }
 0x159   : > { %1019 = vmatprep.subr.bf16.mxu0 %v1360_v18  ;;  %1035 = vmatprep.mubr.msk.bf16.mxu0 %vm1361_vm1, %v1360_v18  ;;  %v1155_v21 = vld [vmem:[%s1560_s15 + $0x20] sm:$0xff]   ;;  %v1156_v22 = vld [vmem:[%s1560_s15 + $0x18] sm:$0xff]   ;;  %v1157_v23 = vld [vmem:[%s1560_s15 + $0x10] sm:$0xff]  }
 0x15a   : > { %1020 = vmatpush3.bf16.msra.mxu0 %v1152_v17  ;;  %v1158_v24 = vld [vmem:[%s1560_s15 + $0x8] sm:$0xff]   ;;  %v1159_v25 = vld [vmem:[%s1560_s15] sm:$0xff]   ;;  %v947_v28 = vld [vmem:[%s413_s25] ss:$0 sm:$0xff]  ;;  %v679_v55 = vshrl.u32 %v678_v54, 7 }
 0x15b   : > { %1021 = vmatprep.subr.bf16.mxu0 %v1360_v18  ;;  %v539_v26 = vld [vmem:[#allocation2] sm:$0xff] }
 0x15c   : > { %v540_v27 = vpack.c.bf16 %v539_v26, %v539_v26  ;;  %v672_v56 = vld [vmem:[%s416_s27] sm:$0x1]  ;;  %v680_v57 = vsub.s32 0, %v679_v55 }
 0x15d   : > { %v956_v62 = vld [vmem:[%s419_s30] ss:$0 sm:$0xff] }
 0x15e   : > { %1022 = vmatpush3.bf16.msra.mxu0 %v1153_v19 }
 0x15f   : > { %1023 = vmatprep.subr.bf16.mxu0 %v1360_v18 }
 0x162   : > { %1024 = vmatpush3.bf16.msra.mxu0 %v1154_v20 }
 0x163   : > { %1025 = vmatprep.subr.bf16.mxu0 %v1360_v18 }
 0x166   : > { %1026 = vmatpush3.bf16.msra.mxu0 %v1155_v21 }
 0x167   : > { %1027 = vmatprep.subr.bf16.mxu0 %v1360_v18 }
 0x16a   : > { %1028 = vmatpush3.bf16.msra.mxu0 %v1156_v22 }
 0x16b   : > { %1029 = vmatprep.subr.bf16.mxu0 %v1360_v18 }
 0x16e   : > { %1030 = vmatpush3.bf16.msra.mxu0 %v1157_v23 }
 0x16f   : > { %1031 = vmatprep.subr.bf16.mxu0 %v1360_v18 }
 0x172   : > { %1032 = vmatpush3.bf16.msra.mxu0 %v1158_v24 }
 0x173   : > { %1033 = vmatprep.subr.bf16.mxu0 %v1360_v18 }
 0x176   : > { %1034 = vmatpush3.bf16.msra.mxu0 %v1159_v25 }
 0x179   : > { %1036 = vmatmul.mubr.bf16.vlgmr.msra.gmra.mxu0 %v540_v27 }
 0x239   : > { %v646_v29 = vpop.f32.mrf.mxu0 }
 0x23a   : > { %v647_v30 = vadd.f32 %v947_v28, %v646_v29 }
 0x23b   : > { %v1037_v31 = vpop.f32.mrf.mxu0 }
 0x23c   : > { %v652_v32 = vmax.f32 %v647_v30, 0.0 }
 0x23d   : > { %v649_v33 = vpop.f32.mrf.mxu0 }
 0x23e   : > { %v653_v34 = vrot.slane %v652_v32, 4  ;;  %v661_v35 = vmul.f32 %v652_v32, %v652_v32 }
 0x23f   : > { %v1038_v36 = vpop.f32.mrf.mxu0 }
 0x240   : > { %v654_v37 = vadd.f32 %v653_v34, %v652_v32  ;;  %v662_v38 = vrot.slane %v661_v35, 4 }
 0x242   : > { %v655_v39 = vrot.slane %v654_v37, 2  ;;  %v663_v40 = vadd.f32 %v662_v38, %v661_v35 }
 0x244   : > { %v656_v41 = vadd.f32 %v655_v39, %v654_v37  ;;  %v664_v42 = vrot.slane %v663_v40, 2 }
 0x246   : > { %v657_v43 = vrot.slane %v656_v41, 1  ;;  %v665_v44 = vadd.f32 %v664_v42, %v663_v40 }
 0x248   : > { %v658_v45 = vadd.f32 %v657_v43, %v656_v41  ;;  %v666_v46 = vrot.slane %v665_v44, 1 }
 0x24a   : > { %v660_v47 = vmul.f32 0.125, %v658_v45  ;;  %v667_v48 = vadd.f32 %v666_v46, %v665_v44 }
 0x24c   : > { %v668_v49 = vmul.f32 0.125, %v667_v48  ;;  %v669_v50 = vmul.f32 %v660_v47, %v660_v47  ;;  %v676_v60 = vsub.f32 %v652_v32, %v660_v47 }
 0x24e   : > { %v670_v51 = vsub.f32 %v668_v49, %v669_v50 }
 0x250   : > { %v671_v52 = vmax.f32 %v670_v51, 0.0 }
 0x252   : > { %v673_v53 = vadd.f32 1e-05, %v671_v52 }
 0x254   : > { %1160 = vrsqrt.f32 %v673_v53 }
 0x261   : > { %v1161_v58 = vpop.eup %1160 }
 0x262   : > { %v675_v59 = vmul.f32 %v1161_v58, %v672_v56 }
 0x264   : > { %v681_v61 = vrot.slane %v675_v59, %v680_v57 }
 0x266   : > { %v683_v63 = vmul.f32 %v681_v61, %v676_v60  ;;  %696 = sbr.rel (%p957_p6) target bundleno = 851 (0x353), region = 80 }
 0x268   : > { %v691_v0 = vadd.f32 %v956_v62, %v683_v63 }
 0x26a   : > { %692 = vst [vmem:[#allocation2] sm:$0xff] %v691_v0 }
 0x26b   : > { %v1162_v1 = vld [vmem:[#allocation9 + $0x38] sm:$0xff]   ;;  %v1362_v2 = vmov 0.0   ;;  %v1163_v3 = vld [vmem:[#allocation9 + $0x30] sm:$0xff]   ;;  %vm1363_vm2 = vmmov 0   ;;  %v1164_v4 = vld [vmem:[#allocation9 + $0x28] sm:$0xff]   ;;  %v697_v9 = vmax.f32 %v691_v0, 0.0 }
 0x26c   : > { %1039 = vmatprep.subr.bf16.mxu0 %v1362_v2  ;;  %1055 = vmatprep.mubr.msk.bf16.mxu0 %vm1363_vm2, %v1362_v2  ;;  %v1165_v5 = vld [vmem:[#allocation9 + $0x20] sm:$0xff]   ;;  %v1166_v6 = vld [vmem:[#allocation9 + $0x18] sm:$0xff]   ;;  %v1167_v7 = vld [vmem:[#allocation9 + $0x10] sm:$0xff]  }
 0x26d   : > { %1040 = vmatpush3.bf16.msra.mxu0 %v1162_v1  ;;  %v1168_v8 = vld [vmem:[#allocation9 + $0x8] sm:$0xff]   ;;  %v1169_v10 = vld [vmem:[#allocation9] sm:$0xff]   ;;  %v698_v11 = vpack.c.bf16 %v697_v9, %v697_v9  ;;  %v958_v12 = vld [vmem:[%s1651_s8] ss:$0 sm:$0xff] }
 0x26e   : > { %1041 = vmatprep.subr.bf16.mxu0 %v1362_v2 }
 0x271   : > { %1042 = vmatpush3.bf16.msra.mxu0 %v1163_v3 }
 0x272   : > { %1043 = vmatprep.subr.bf16.mxu0 %v1362_v2 }
 0x275   : > { %1044 = vmatpush3.bf16.msra.mxu0 %v1164_v4 }
 0x276   : > { %1045 = vmatprep.subr.bf16.mxu0 %v1362_v2 }
 0x279   : > { %1046 = vmatpush3.bf16.msra.mxu0 %v1165_v5 }
 0x27a   : > { %1047 = vmatprep.subr.bf16.mxu0 %v1362_v2 }
 0x27d   : > { %1048 = vmatpush3.bf16.msra.mxu0 %v1166_v6 }
 0x27e   : > { %1049 = vmatprep.subr.bf16.mxu0 %v1362_v2 }
 0x281   : > { %1050 = vmatpush3.bf16.msra.mxu0 %v1167_v7 }
 0x282   : > { %1051 = vmatprep.subr.bf16.mxu0 %v1362_v2 }
 0x285   : > { %1052 = vmatpush3.bf16.msra.mxu0 %v1168_v8 }
 0x286   : > { %1053 = vmatprep.subr.bf16.mxu0 %v1362_v2 }
 0x289   : > { %1054 = vmatpush3.bf16.msra.mxu0 %v1169_v10 }
 0x28c   : > { %1056 = vmatmul.mubr.bf16.vlgmr.msra.gmra.mxu0 %v698_v11 }
 0x34c   : > { %v804_v13 = vpop.f32.mrf.mxu0 }
 0x34d   : > { %v805_v14 = vadd.f32 %v958_v12, %v804_v13 }
 0x34e   : > { %v1057_v15 = vpop.f32.mrf.mxu0 }
 0x34f   : > { %810 = vst [vmem:[#allocation10] sm:$0xff] %v805_v14 }
 0x350   : > { %v807_v16 = vpop.f32.mrf.mxu0 }
 0x352   : > { %v1058_v17 = vpop.f32.mrf.mxu0 }
 0x353 PF: > { %p1098_p7 = scmp.eq.s32.totalorder %s1434_s13, 1  ;;  %s1364_s29 = smov [#allocation10]  }
 0x354   : > { %s818_s23 = sshll.u32 %s1364_s29, 4  ;;  %s819_s23 = int_to_ptr.vmem [resolvable:$true] %s818_s23 }
 0x355   : > { %s1276_s25 = scalar_lea.vmem %s819_s23, 128  ;;  %p1283_p12 = scmp.lt.s32.totalorder %s819_s23, %s819_s23 }
 0x356   : > { %p1277_p1 = scmp.ne.s32.totalorder %s819_s23, %s1276_s25  ;;  %p1284_p2 = scmp.lt.s32.totalorder %s1276_s25, %s1276_s25 }
 0x358   : > { %p1278_p4 = pnand %p1277_p1, %p1098_p7  ;;  %p1285_p3 = por %p1284_p2, %p1283_p12 }
 0x35a   : > { %p1279_p13 = pneg %p1278_p4 }
 0x35c   : > { %p1286_p5 = pnand %p1285_p3, %p1279_p13 }
 0x35e   : > { %1289 = shalt.err (!%p1286_p5)
}
 0x35f   : > { %1074 = dma.vmem_to_hbm [thread:$0]  (%p1098_p7), %s819_s23, 128, %s1652_s9, [#allocation5]  }
 0x360   : > { %1333 = dma.done.wait (%p1098_p7), [#allocation5], 128  }
 0x361   : > { %1335 = vsyncadd (%p1098_p7), [#allocation5], 4294967168 }
 0x362 PF: > { %s1677_s27 = sld [smem:[#allocation16_spill]]  ;;  %p19_p11 = scmp.ge.s32.totalorder %s1437_s14, 4  }
 0x363   : > { %s1678_s30 = smov %s1342_s10  ;;  %s1679_s10 = smov %s1346_s11 }
 0x364   : > { %s1681_s12 = smov %s1437_s14  ;;  %21 = sbr.rel (!%p19_p11) target bundleno = 7 (0x7), region = 121 }
 0x368   : > { %s1680_s11 = smov %s1677_s27 }
 0x369   :  { %831 = vsyncpa [#allocation4], 1 }
 0x36a   :  { %833 = vsyncpa [#allocation4 + $0x1], 1 }
 0x36b   :  { %834 = vsyncpa [#allocation7], 1 }
 0x36c   :  { %835 = vsyncpa [#allocation5], 1 }
 0x36d   :  { %837 = vsyncpa [#allocation5 + $0x1], 1 }

</bundles_post_ra>
